<compile_context>
chip_gen: v5e
topology: v5e:2x2
jax: 0.10.0
libtpu: 0.0.40
codegen_flags: <defaults>
</compile_context>

<pallas_src>
import jax
import jax.numpy as jnp
import numpy as np
from jax.experimental import pallas as pl
from jax.experimental.pallas import tpu as pltpu

# ---- sizes (small, synthetic forest: max_depth=3 as in the module defaults) ----
N = 128           # samples
F = 16            # features
T = 8             # number of trees
DEPTH = 3         # max_depth=3
N_NODES = 2 ** DEPTH - 1    # 7 internal nodes / tree (complete binary tree)
N_LEAVES = 2 ** DEPTH       # 8 leaves / tree

LANE = 128        # per-node lane stride (column c = node*LANE + tree), zero padded
TILE_N = 128      # sample tile (multiple of 8; 128 keeps the in-kernel transpose square)


def rf_predict_kernel(x_ref, feat_ref, thr_ref, leaf_ref, out_ref):
    x = x_ref[...]                                                        # [TILE_N, F]

    # Gather the feature value used by every (node, tree) pair via one-hot matmul (MXU).
    vals = jnp.dot(x, feat_ref[...], preferred_element_type=jnp.float32)  # [TILE_N, 7*LANE]

    # sklearn decision rule (scaler folded into thresholds): go right iff x[f] > thr'.
    go_right = vals > thr_ref[...]                                        # [TILE_N, 7*LANE]

    def node(k):      # decision bits of internal node k — one lane-aligned vreg block
        return go_right[:, k * LANE:(k + 1) * LANE]                       # [TILE_N, LANE]

    def leaf(l):      # class-1 probability (already /T) of leaf l, per tree, broadcast rows
        return leaf_ref[:, l * LANE:(l + 1) * LANE]                       # [1, LANE]

    # Branch-free depth-3 traversal with the leaf lookup folded in: 7 f32 selects.
    left = jnp.where(node(1),
                     jnp.where(node(4), leaf(3), leaf(2)),
                     jnp.where(node(3), leaf(1), leaf(0)))
    right = jnp.where(node(2),
                      jnp.where(node(6), leaf(7), leaf(6)),
                      jnp.where(node(5), leaf(5), leaf(4)))
    proba = jnp.where(node(0), right, left)                               # [TILE_N, LANE]

    # Average over trees (leaf values pre-divided by T, padded lanes are 0) and
    # store a lane-dense (1, TILE_N) row: one vxpose + sublane reduce.
    out_ref[...] = jnp.sum(proba.T, axis=0, keepdims=True)                # [1, TILE_N]


def make_forest_params(mean, scale, feat_idx, thresholds, leaf_probs):
    """One-time (model-load) prep of forest constants; keep out of the predict path."""
    mean = jnp.asarray(mean, jnp.float32)            # [F]
    scale = jnp.asarray(scale, jnp.float32)          # [F]
    feat_idx = jnp.asarray(feat_idx, jnp.int32)      # [T, N_NODES]
    thresholds = jnp.asarray(thresholds, jnp.float32)  # [T, N_NODES]
    leaf_probs = jnp.asarray(leaf_probs, jnp.float32)  # [T, N_LEAVES]

    # Fold StandardScaler into the split thresholds (scale > 0, so the compare commutes).
    thr_fold = thresholds * scale[feat_idx] + mean[feat_idx]              # [T, N_NODES]

    # Column c = node*LANE + tree; lanes T..LANE-1 are zero padding.
    onehot = jax.nn.one_hot(feat_idx.T, F, dtype=jnp.float32)             # [N_NODES, T, F]
    onehot = jnp.pad(onehot, ((0, 0), (0, LANE - T), (0, 0)))             # [N_NODES, LANE, F]
    feat_onehot = onehot.reshape(N_NODES * LANE, F).T                     # [F, N_NODES*LANE]

    thr_flat = jnp.pad(thr_fold.T, ((0, 0), (0, LANE - T)))               # [N_NODES, LANE]
    thr_flat = thr_flat.reshape(1, N_NODES * LANE)                        # [1, N_NODES*LANE]

    leaf_flat = jnp.pad((leaf_probs / T).T, ((0, 0), (0, LANE - T)))      # [N_LEAVES, LANE]
    leaf_flat = leaf_flat.reshape(1, N_LEAVES * LANE)                     # [1, N_LEAVES*LANE]

    return feat_onehot, thr_flat, leaf_flat


def rf_predict(x, feat_onehot, thr_flat, leaf_flat):
    """predict_proba(StandardScaler(x))[:, 1].reshape(-1, 1, 1)  (class-1 probability)."""
    n = x.shape[0]
    assert n % TILE_N == 0, "sample count must be a multiple of TILE_N"

    out = pl.pallas_call(
        rf_predict_kernel,
        out_shape=jax.ShapeDtypeStruct((1, n), jnp.float32),
        grid=(n // TILE_N,),
        in_specs=[
            pl.BlockSpec((TILE_N, F), lambda i: (i, 0)),
            pl.BlockSpec((F, N_NODES * LANE), lambda i: (0, 0)),
            pl.BlockSpec((1, N_NODES * LANE), lambda i: (0, 0)),
            pl.BlockSpec((1, N_LEAVES * LANE), lambda i: (0, 0)),
        ],
        out_specs=pl.BlockSpec((1, TILE_N), lambda i: (0, i)),
        compiler_params=pltpu.CompilerParams(dimension_semantics=("parallel",)),
    )(x.astype(jnp.float32), feat_onehot, thr_flat, leaf_flat)

    return out.reshape(-1, 1, 1)   # row-major (1, N) -> (N, 1, 1) is a free bitcast


def rf_predict_reference(x, mean, scale, feat_idx, thresholds, leaf_probs):
    """Pure NumPy reference of the same synthetic forest (unfolded scaler)."""
    xs = (np.asarray(x) - np.asarray(mean)) / np.asarray(scale)
    fi = np.asarray(feat_idx)
    th = np.asarray(thresholds)
    lp = np.asarray(leaf_probs)
    n = xs.shape[0]
    proba = np.zeros((n, T), dtype=np.float64)
    for t in range(T):
        node = np.zeros(n, dtype=np.int64)
        for _ in range(DEPTH):
            val = xs[np.arange(n), fi[t, node]]
            go_right = val > th[t, node]
            node = 2 * node + 1 + go_right.astype(np.int64)
        leaf = node - N_NODES
        proba[:, t] = lp[t, leaf]
    return proba.mean(axis=-1).reshape(-1, 1, 1)


if __name__ == "__main__":
    key = jax.random.PRNGKey(0)
    k_x, k_mean, k_scale, k_feat, k_thr, k_leaf = jax.random.split(key, 6)

    mean = jax.random.normal(k_mean, (F,), dtype=jnp.float32)
    scale = jax.random.uniform(k_scale, (F,), minval=0.5, maxval=1.5, dtype=jnp.float32)
    x = mean + scale * jax.random.normal(k_x, (N, F), dtype=jnp.float32)

    feat_idx = jax.random.randint(k_feat, (T, N_NODES), 0, F, dtype=jnp.int32)
    thresholds = jax.random.normal(k_thr, (T, N_NODES), dtype=jnp.float32) * 0.5
    leaf_probs = jax.random.uniform(k_leaf, (T, N_LEAVES), dtype=jnp.float32)  # P(class=1)/leaf

    # One-time model-load prep (hoisted out of the per-call path).
    params = jax.tree_util.tree_map(jax.block_until_ready,
                                    make_forest_params(mean, scale, feat_idx,
                                                       thresholds, leaf_probs))

    predict = jax.jit(rf_predict)
    out = predict(x, *params)
    out = jax.block_until_ready(out)

    ref = rf_predict_reference(x, mean, scale, feat_idx, thresholds, leaf_probs)
    np.testing.assert_allclose(np.asarray(out), ref, rtol=1e-5, atol=1e-5)
    assert out.shape == (N, 1, 1)

    print("KERNEL_OK")
</pallas_src>

<mosaic_0001>
module attributes {stable_mosaic.version = 11 : i64} {
  func.func @rf_predict_kernel(%arg0: i32, %arg1: memref<128x16xf32, #tpu.memory_space<vmem>>, %arg2: memref<16x896xf32, #tpu.memory_space<vmem>>, %arg3: memref<1x896xf32, #tpu.memory_space<vmem>>, %arg4: memref<1x1024xf32, #tpu.memory_space<vmem>>, %arg5: memref<1x128xf32, #tpu.memory_space<vmem>>) attributes {dimension_semantics = [#tpu.dimension_semantics<parallel>], iteration_bounds = array<i64: 1>, scalar_prefetch = 0 : i64, scratch_operands = 0 : i64, tpu.core_type = #tpu.core_type<tc>, window_params = [{transform_indices = @transform_0, window_bounds = array<i64: 128, 16>}, {pipeline_mode = #tpu.pipeline_mode<synchronous>, transform_indices = @transform_1, window_bounds = array<i64: 16, 896>}, {pipeline_mode = #tpu.pipeline_mode<synchronous>, transform_indices = @transform_2, window_bounds = array<i64: 1, 896>}, {pipeline_mode = #tpu.pipeline_mode<synchronous>, transform_indices = @transform_3, window_bounds = array<i64: 1, 1024>}, {transform_indices = @transform_4, window_bounds = array<i64: 1, 128>}]} {
    %c0 = arith.constant 0 : index
    %c0_0 = arith.constant 0 : index
    %0 = vector.load %arg1[%c0, %c0_0] : memref<128x16xf32, #tpu.memory_space<vmem>>, vector<128x16xf32>
    %c0_1 = arith.constant 0 : index
    %c0_2 = arith.constant 0 : index
    %1 = vector.load %arg2[%c0_1, %c0_2] : memref<16x896xf32, #tpu.memory_space<vmem>>, vector<16x896xf32>
    %cst = arith.constant dense<0.000000e+00> : vector<128x896xf32>
    %2 = tpu.matmul %0, %1, %cst {dimension_numbers = #tpu.dot_dimension_numbers<[1], [0], [0], [1], [0, 0, 1, 1], [], []>} : vector<128x16xf32>, vector<16x896xf32>, vector<128x896xf32> -> vector<128x896xf32>
    %c0_3 = arith.constant 0 : index
    %c0_4 = arith.constant 0 : index
    %3 = vector.load %arg3[%c0_3, %c0_4] : memref<1x896xf32, #tpu.memory_space<vmem>>, vector<1x896xf32>
    %4 = vector.broadcast %3 : vector<1x896xf32> to vector<128x896xf32>
    %5 = arith.cmpf ogt, %2, %4 : vector<128x896xf32>
    %6 = vector.extract_strided_slice %5 {offsets = [0, 128], sizes = [128, 128], strides = [1, 1]} : vector<128x896xi1> to vector<128x128xi1>
    %7 = vector.extract_strided_slice %5 {offsets = [0, 512], sizes = [128, 128], strides = [1, 1]} : vector<128x896xi1> to vector<128x128xi1>
    %c0_5 = arith.constant 0 : index
    %c384 = arith.constant 384 : index
    %8 = vector.load %arg4[%c0_5, %c384] : memref<1x1024xf32, #tpu.memory_space<vmem>>, vector<1x128xf32>
    %c0_6 = arith.constant 0 : index
    %c256 = arith.constant 256 : index
    %9 = vector.load %arg4[%c0_6, %c256] : memref<1x1024xf32, #tpu.memory_space<vmem>>, vector<1x128xf32>
    %10 = vector.shape_cast %8 : vector<1x128xf32> to vector<1x128xf32>
    %11 = vector.broadcast %10 : vector<1x128xf32> to vector<128x128xf32>
    %12 = vector.shape_cast %9 : vector<1x128xf32> to vector<1x128xf32>
    %13 = vector.broadcast %12 : vector<1x128xf32> to vector<128x128xf32>
    %14 = arith.select %7, %11, %13 : vector<128x128xi1>, vector<128x128xf32>
    %15 = vector.extract_strided_slice %5 {offsets = [0, 384], sizes = [128, 128], strides = [1, 1]} : vector<128x896xi1> to vector<128x128xi1>
    %c0_7 = arith.constant 0 : index
    %c128 = arith.constant 128 : index
    %16 = vector.load %arg4[%c0_7, %c128] : memref<1x1024xf32, #tpu.memory_space<vmem>>, vector<1x128xf32>
    %c0_8 = arith.constant 0 : index
    %c0_9 = arith.constant 0 : index
    %17 = vector.load %arg4[%c0_8, %c0_9] : memref<1x1024xf32, #tpu.memory_space<vmem>>, vector<1x128xf32>
    %18 = vector.shape_cast %16 : vector<1x128xf32> to vector<1x128xf32>
    %19 = vector.broadcast %18 : vector<1x128xf32> to vector<128x128xf32>
    %20 = vector.shape_cast %17 : vector<1x128xf32> to vector<1x128xf32>
    %21 = vector.broadcast %20 : vector<1x128xf32> to vector<128x128xf32>
    %22 = arith.select %15, %19, %21 : vector<128x128xi1>, vector<128x128xf32>
    %23 = arith.select %6, %14, %22 : vector<128x128xi1>, vector<128x128xf32>
    %24 = vector.extract_strided_slice %5 {offsets = [0, 256], sizes = [128, 128], strides = [1, 1]} : vector<128x896xi1> to vector<128x128xi1>
    %25 = vector.extract_strided_slice %5 {offsets = [0, 768], sizes = [128, 128], strides = [1, 1]} : vector<128x896xi1> to vector<128x128xi1>
    %c0_10 = arith.constant 0 : index
    %c896 = arith.constant 896 : index
    %26 = vector.load %arg4[%c0_10, %c896] : memref<1x1024xf32, #tpu.memory_space<vmem>>, vector<1x128xf32>
    %c0_11 = arith.constant 0 : index
    %c768 = arith.constant 768 : index
    %27 = vector.load %arg4[%c0_11, %c768] : memref<1x1024xf32, #tpu.memory_space<vmem>>, vector<1x128xf32>
    %28 = vector.shape_cast %26 : vector<1x128xf32> to vector<1x128xf32>
    %29 = vector.broadcast %28 : vector<1x128xf32> to vector<128x128xf32>
    %30 = vector.shape_cast %27 : vector<1x128xf32> to vector<1x128xf32>
    %31 = vector.broadcast %30 : vector<1x128xf32> to vector<128x128xf32>
    %32 = arith.select %25, %29, %31 : vector<128x128xi1>, vector<128x128xf32>
    %33 = vector.extract_strided_slice %5 {offsets = [0, 640], sizes = [128, 128], strides = [1, 1]} : vector<128x896xi1> to vector<128x128xi1>
    %c0_12 = arith.constant 0 : index
    %c640 = arith.constant 640 : index
    %34 = vector.load %arg4[%c0_12, %c640] : memref<1x1024xf32, #tpu.memory_space<vmem>>, vector<1x128xf32>
    %c0_13 = arith.constant 0 : index
    %c512 = arith.constant 512 : index
    %35 = vector.load %arg4[%c0_13, %c512] : memref<1x1024xf32, #tpu.memory_space<vmem>>, vector<1x128xf32>
    %36 = vector.shape_cast %34 : vector<1x128xf32> to vector<1x128xf32>
    %37 = vector.broadcast %36 : vector<1x128xf32> to vector<128x128xf32>
    %38 = vector.shape_cast %35 : vector<1x128xf32> to vector<1x128xf32>
    %39 = vector.broadcast %38 : vector<1x128xf32> to vector<128x128xf32>
    %40 = arith.select %33, %37, %39 : vector<128x128xi1>, vector<128x128xf32>
    %41 = arith.select %24, %32, %40 : vector<128x128xi1>, vector<128x128xf32>
    %42 = vector.extract_strided_slice %5 {offsets = [0, 0], sizes = [128, 128], strides = [1, 1]} : vector<128x896xi1> to vector<128x128xi1>
    %43 = arith.select %42, %41, %23 : vector<128x128xi1>, vector<128x128xf32>
    %44 = tpu.transpose %43, [1, 0] : vector<128x128xf32> -> vector<128x128xf32>
    %cst_14 = arith.constant dense<0.000000e+00> : vector<128xf32>
    %45 = vector.multi_reduction <add>, %44, %cst_14 [0] : vector<128x128xf32> to vector<128xf32>
    %46 = vector.shape_cast %45 : vector<128xf32> to vector<1x128xf32>
    %c0_15 = arith.constant 0 : index
    %c0_16 = arith.constant 0 : index
    %47 = vector.load %arg5[%c0_15, %c0_16] : memref<1x128xf32, #tpu.memory_space<vmem>>, vector<1x128xf32>
    tpu.vector_store %arg5[%c0_15, %c0_16], %46 {strides = array<i32>} : memref<1x128xf32, #tpu.memory_space<vmem>>, vector<1x128xf32>,
    return
  }
  func.func @transform_0(%arg0: i32) -> (i32, i32) {
    %c0_i32 = arith.constant 0 : i32
    %c0_i32_0 = arith.constant 0 : i32
    return %arg0, %c0_i32 : i32, i32
  }
  func.func @transform_1(%arg0: i32) -> (i32, i32) {
    %c0_i32 = arith.constant 0 : i32
    %c0_i32_0 = arith.constant 0 : i32
    %c0_i32_1 = arith.constant 0 : i32
    return %c0_i32, %c0_i32_0 : i32, i32
  }
  func.func @transform_2(%arg0: i32) -> (i32, i32) {
    %c0_i32 = arith.constant 0 : i32
    %c0_i32_0 = arith.constant 0 : i32
    %c0_i32_1 = arith.constant 0 : i32
    return %c0_i32, %c0_i32_0 : i32, i32
  }
  func.func @transform_3(%arg0: i32) -> (i32, i32) {
    %c0_i32 = arith.constant 0 : i32
    %c0_i32_0 = arith.constant 0 : i32
    %c0_i32_1 = arith.constant 0 : i32
    return %c0_i32, %c0_i32_0 : i32, i32
  }
  func.func @transform_4(%arg0: i32) -> (i32, i32) {
    %c0_i32 = arith.constant 0 : i32
    %c0_i32_0 = arith.constant 0 : i32
    return %c0_i32, %arg0 : i32, i32
  }
}

</mosaic_0001>

<bundles_post_ra>
// kernel: rf_predict.1
= control target key start
LH: loop header
LB: loop body
LE: loop exit
PB: predicated region body
PF: predicated region fallthrough
CT: control target
= control target key end

     0   :  { %vm48_vm0 = vcmask 130048   ;;  %s1863_s0 = inlined_call_operand.vmem [shape: f32[128,16], index: 0, kind: input, shape index: {}]   ;;  %s1864_s1 = inlined_call_operand.vmem [shape: f32[16,896], index: 1, kind: input, shape index: {}]   ;;  %s1865_s2 = inlined_call_operand.vmem [shape: f32[1,896], index: 2, kind: input, shape index: {}]   ;;  %s1866_s3 = inlined_call_operand.vmem [shape: f32[1,1024], index: 3, kind: input, shape index: {}]   ;;  %s1867_s4 = inlined_call_operand.hbm [shape: f32[1,128], index: 4, kind: output, shape index: {}]  }
   0x1   :  { %v41_v0 = vld [vmem:[%s1864_s1 + $0x38] sm:$0xff]  ;;  %v43_v1 = vld [vmem:[%s1864_s1 + $0x48] sm:$0xff]  ;;  %v34_v2 = vld [vmem:[%s1864_s1] sm:$0xff] }
   0x2   :  { %1006 = vmatpush.msra.mxu3 %v41_v0  ;;  %241 = vmatpush.msra.mxu2 %v43_v1  ;;  %v36_v3 = vld [vmem:[%s1864_s1 + $0x10] sm:$0xff]  ;;  %v1088_v4 = vld [vmem:[%s1863_s0 + $0x60] sm:$0xff]  ;;  %v47_v7 = vld [vmem:[%s1864_s1 + $0x68] sm:$0xff] }
   0x3   :  { %v42_v5 = vld [vmem:[%s1864_s1 + $0x40] sm:$0xff]  ;;  %111 = vmatpush.msra.mxu0 %v41_v0  ;;  %v35_v8 = vld [vmem:[%s1864_s1 + $0x8] sm:$0xff]  ;;  %v45_v9 = vld [vmem:[%s1864_s1 + $0x58] sm:$0xff] }
   0x4   :  { %v1096_v6 = vld [vmem:[%s1863_s0] sm:$0xff]  ;;  %176 = vmatpush.msra.mxu1 %v42_v5  ;;  %1007 = vmatpush.msra.mxu3 %v34_v2 }
   0x5   :  { %242 = vmatpush.msra.mxu2 %v36_v3  ;;  %906 = vmatmul.msk.f32.vlgmr.msra.gmra.mxu3 %vm48_vm0, %v1088_v4  ;;  %v46_v10 = vld [vmem:[%s1864_s1 + $0x60] sm:$0xff] }
   0x6   :  { %926 = vmatmul.msk.f32.vlgmr.msra.gmra.mxu2 %vm48_vm0, %v1096_v6  ;;  %1008 = vmatpush.msrb.mxu3 %v42_v5 }
   0x7   :  { %501 = vmatpush.msrb.mxu2 %v47_v7  ;;  %112 = vmatpush.msra.mxu0 %v34_v2 }
   0x8   :  { %177 = vmatpush.msra.mxu1 %v35_v8  ;;  %894 = vmatmul.msk.f32.vlgmr.msra.gmra.mxu0 %vm48_vm0, %v1096_v6 }
   0x9   :  { %910 = vmatmul.msk.f32.vlgmr.msra.gmra.mxu1 %vm48_vm0, %v1096_v6  ;;  %371 = vmatpush.msrb.mxu0 %v45_v9 }
   0xa   :  { %436 = vmatpush.msrb.mxu1 %v46_v10 }
   0xb   :  { %9 = vsyncpa [#allocation3], 0  ;;  %v1121_v11 = vld [vmem:[%s1863_s0 + $0x68] sm:$0xff]  ;;  %1009 = vmatpush.msrb.mxu3 %v35_v8  ;;  %v1139_v13 = vld [vmem:[%s1863_s0 + $0x70] sm:$0xff] }
   0xc   :  { %v1126_v12 = vld [vmem:[%s1863_s0 + $0x8] sm:$0xff]  ;;  %v1144_v14 = vld [vmem:[%s1863_s0 + $0x10] sm:$0xff]  ;;  %v38_v16 = vld [vmem:[%s1864_s1 + $0x20] sm:$0xff] }
   0xd   :  { %1010 = vmatpush.msra.mxu3 %v43_v1  ;;  %v40_v15 = vld [vmem:[%s1864_s1 + $0x30] sm:$0xff]  ;;  %v39_v17 = vld [vmem:[%s1864_s1 + $0x28] sm:$0xff]  ;;  %372 = vmatpush.msrb.mxu0 %v38_v16  ;;  %v1166_v18 = vld [vmem:[%s1863_s0 + $0x78] sm:$0xff] }
   0xe   :  { %907 = vmatmul.msk.f32.gmra.mxu3 %vm48_vm0, %v1121_v11  ;;  %927 = vmatmul.msk.f32.gmra.mxu2 %vm48_vm0, %v1126_v12  ;;  %v1171_v19 = vld [vmem:[%s1863_s0 + $0x18] sm:$0xff]  ;;  %v1184_v20 = vld [vmem:[%s1863_s0 + $0x20] sm:$0xff]  ;;  %v44_v21 = vld [vmem:[%s1864_s1 + $0x50] sm:$0xff] }
   0xf   :  { %1011 = vmatpush.msra.mxu3 %v36_v3  ;;  %502 = vmatpush.msrb.mxu2 %v40_v15  ;;  %v1200_v22 = vld [vmem:[%s1863_s0 + $0x28] sm:$0xff]  ;;  %v1213_v23 = vld [vmem:[%s1863_s0 + $0x30] sm:$0xff]  ;;  %v37_v24 = vld [vmem:[%s1864_s1 + $0x18] sm:$0xff]  ;;  %s885_s1 = sshll.u32 %s1867_s4, 4  ;;  %s886_s1 = int_to_ptr.hbm [resolvable:$true] %s885_s1 }
  0x10   :  { %895 = vmatmul.msk.f32.gmra.mxu0 %vm48_vm0, %v1126_v12  ;;  %437 = vmatpush.msrb.mxu1 %v39_v17  ;;  %v1229_v25 = vld [vmem:[%s1863_s0 + $0x38] sm:$0xff]  ;;  %v1242_v26 = vld [vmem:[%s1863_s0 + $0x40] sm:$0xff]  ;;  %v1255_v27 = vld [vmem:[%s1863_s0 + $0x48] sm:$0xff] }
  0x11   :  { %911 = vmatmul.msk.f32.gmra.mxu1 %vm48_vm0, %v1126_v12  ;;  %v1268_v28 = vld [vmem:[%s1863_s0 + $0x50] sm:$0xff]  ;;  %v1281_v29 = vld [vmem:[%s1863_s0 + $0x58] sm:$0xff]  ;;  %v1525_v17 = vld [vmem:[%s1866_s3 + $0x3] ss:$0 sm:$0xff] }
  0x16   :  { %908 = vmatmul.msk.f32.gmra.mxu3 %vm48_vm0, %v1139_v13  ;;  %928 = vmatmul.msk.f32.gmra.mxu2 %vm48_vm0, %v1144_v14 }
  0x18   :  { %896 = vmatmul.msk.f32.gmra.mxu0 %vm48_vm0, %v1144_v14 }
  0x19   :  { %912 = vmatmul.msk.f32.gmra.mxu1 %vm48_vm0, %v1144_v14 }
  0x1e   :  { %909 = vmatmul.msk.f32.gmra.mxu3 %vm48_vm0, %v1166_v18  ;;  %929 = vmatmul.msk.f32.gmra.mxu2 %vm48_vm0, %v1171_v19 }
  0x20   :  { %897 = vmatmul.msk.f32.gmra.mxu0 %vm48_vm0, %v1171_v19 }
  0x21   :  { %913 = vmatmul.msk.f32.gmra.mxu1 %vm48_vm0, %v1171_v19 }
  0x26   :  { %922 = vmatmul.msk.f32.vlgmr.msrb.gmra.mxu3 %vm48_vm0, %v1088_v4  ;;  %930 = vmatmul.msk.f32.gmra.mxu2 %vm48_vm0, %v1184_v20 }
  0x27   :  { %306 = vmatpush.msrb.mxu3 %v44_v21 }
  0x28   :  { %898 = vmatmul.msk.f32.gmra.mxu0 %vm48_vm0, %v1184_v20 }
  0x29   :  { %914 = vmatmul.msk.f32.gmra.mxu1 %vm48_vm0, %v1184_v20  ;;  %307 = vmatpush.msrb.mxu3 %v37_v24  ;;  %v1551_v24 = vld [vmem:[%s1866_s3 + $0x1] ss:$0 sm:$0xff] }
  0x2e   :  { %923 = vmatmul.msk.f32.gmra.mxu3 %vm48_vm0, %v1121_v11  ;;  %931 = vmatmul.msk.f32.gmra.mxu2 %vm48_vm0, %v1200_v22 }
  0x30   :  { %899 = vmatmul.msk.f32.gmra.mxu0 %vm48_vm0, %v1200_v22 }
  0x31   :  { %915 = vmatmul.msk.f32.gmra.mxu1 %vm48_vm0, %v1200_v22 }
  0x36   :  { %924 = vmatmul.msk.f32.gmra.mxu3 %vm48_vm0, %v1139_v13  ;;  %932 = vmatmul.msk.f32.gmra.mxu2 %vm48_vm0, %v1213_v23 }
  0x38   :  { %900 = vmatmul.msk.f32.gmra.mxu0 %vm48_vm0, %v1213_v23 }
  0x39   :  { %916 = vmatmul.msk.f32.gmra.mxu1 %vm48_vm0, %v1213_v23 }
  0x3e   :  { %925 = vmatmul.msk.f32.gmra.mxu3 %vm48_vm0, %v1166_v18  ;;  %933 = vmatmul.msk.f32.gmra.mxu2 %vm48_vm0, %v1229_v25 }
  0x40   :  { %901 = vmatmul.msk.f32.gmra.mxu0 %vm48_vm0, %v1229_v25 }
  0x41   :  { %917 = vmatmul.msk.f32.gmra.mxu1 %vm48_vm0, %v1229_v25 }
  0x46   :  { %934 = vmatmul.msk.f32.gmra.mxu2 %vm48_vm0, %v1242_v26  ;;  %938 = vmatmul.msk.f32.vlgmr.msra.gmra.mxu3 %vm48_vm0, %v1088_v4 }
  0x48   :  { %902 = vmatmul.msk.f32.gmra.mxu0 %vm48_vm0, %v1242_v26 }
  0x49   :  { %918 = vmatmul.msk.f32.gmra.mxu1 %vm48_vm0, %v1242_v26 }
  0x4e   :  { %935 = vmatmul.msk.f32.gmra.mxu2 %vm48_vm0, %v1255_v27  ;;  %939 = vmatmul.msk.f32.gmra.mxu3 %vm48_vm0, %v1121_v11 }
  0x50   :  { %903 = vmatmul.msk.f32.gmra.mxu0 %vm48_vm0, %v1255_v27 }
  0x51   :  { %919 = vmatmul.msk.f32.gmra.mxu1 %vm48_vm0, %v1255_v27 }
  0x56   :  { %936 = vmatmul.msk.f32.gmra.mxu2 %vm48_vm0, %v1268_v28  ;;  %940 = vmatmul.msk.f32.gmra.mxu3 %vm48_vm0, %v1139_v13 }
  0x58   :  { %904 = vmatmul.msk.f32.gmra.mxu0 %vm48_vm0, %v1268_v28 }
  0x59   :  { %920 = vmatmul.msk.f32.gmra.mxu1 %vm48_vm0, %v1268_v28 }
  0x5e   :  { %937 = vmatmul.msk.f32.gmra.mxu2 %vm48_vm0, %v1281_v29  ;;  %941 = vmatmul.msk.f32.gmra.mxu3 %vm48_vm0, %v1166_v18 }
  0x60   :  { %905 = vmatmul.msk.f32.gmra.mxu0 %vm48_vm0, %v1281_v29 }
  0x61   :  { %921 = vmatmul.msk.f32.gmra.mxu1 %vm48_vm0, %v1281_v29 }
  0x66   :  { %942 = vmatmul.msk.f32.vlgmr.msrb.gmra.mxu3 %vm48_vm0, %v1096_v6  ;;  %990 = vmatmul.msk.f32.vlgmr.msrb.gmra.mxu2 %vm48_vm0, %v1096_v6 }
  0x68   :  { %958 = vmatmul.msk.f32.vlgmr.msrb.gmra.mxu0 %vm48_vm0, %v1096_v6 }
  0x69   :  { %974 = vmatmul.msk.f32.vlgmr.msrb.gmra.mxu1 %vm48_vm0, %v1096_v6 }
  0x6e   :  { %943 = vmatmul.msk.f32.gmra.mxu3 %vm48_vm0, %v1126_v12  ;;  %991 = vmatmul.msk.f32.gmra.mxu2 %vm48_vm0, %v1126_v12 }
  0x70   :  { %959 = vmatmul.msk.f32.gmra.mxu0 %vm48_vm0, %v1126_v12 }
  0x71   :  { %975 = vmatmul.msk.f32.gmra.mxu1 %vm48_vm0, %v1126_v12 }
  0x76   :  { %944 = vmatmul.msk.f32.gmra.mxu3 %vm48_vm0, %v1144_v14  ;;  %992 = vmatmul.msk.f32.gmra.mxu2 %vm48_vm0, %v1144_v14 }
  0x78   :  { %960 = vmatmul.msk.f32.gmra.mxu0 %vm48_vm0, %v1144_v14 }
  0x79   :  { %976 = vmatmul.msk.f32.gmra.mxu1 %vm48_vm0, %v1144_v14 }
  0x7e   :  { %945 = vmatmul.msk.f32.gmra.mxu3 %vm48_vm0, %v1171_v19  ;;  %993 = vmatmul.msk.f32.gmra.mxu2 %vm48_vm0, %v1171_v19 }
  0x80   :  { %961 = vmatmul.msk.f32.gmra.mxu0 %vm48_vm0, %v1171_v19 }
  0x81   :  { %977 = vmatmul.msk.f32.gmra.mxu1 %vm48_vm0, %v1171_v19  ;;  %v1530_v19 = vld [vmem:[%s1866_s3 + $0x2] ss:$0 sm:$0xff] }
  0x85   :  { %v1327_v30 = vpop.f32.mrf.mxu0 }
  0x86   :  { %946 = vmatmul.msk.f32.gmra.mxu3 %vm48_vm0, %v1184_v20  ;;  %994 = vmatmul.msk.f32.gmra.mxu2 %vm48_vm0, %v1184_v20  ;;  %v1329_v31 = vpop.f32.mrf.mxu1 }
  0x88   :  { %v1331_v32 = vpop.f32.mrf.mxu3  ;;  %962 = vmatmul.msk.f32.gmra.mxu0 %vm48_vm0, %v1184_v20 }
  0x89   :  { %1868 = vst [vmem:[#allocation5_spill] sm:$0xff] %v1331_v32  ;;  %v1333_v33 = vpop.f32.mrf.mxu2  ;;  %978 = vmatmul.msk.f32.gmra.mxu1 %vm48_vm0, %v1184_v20  ;;  %v1540_v20 = vld [vmem:[%s1866_s3 + $0x4] ss:$0 sm:$0xff] }
  0x8d   :  { %v1343_v34 = vpop.f32.mrf.mxu0 }
  0x8e   :  { %947 = vmatmul.msk.f32.gmra.mxu3 %vm48_vm0, %v1200_v22  ;;  %995 = vmatmul.msk.f32.gmra.mxu2 %vm48_vm0, %v1200_v22  ;;  %v1345_v35 = vpop.f32.mrf.mxu1 }
  0x90   :  { %963 = vmatmul.msk.f32.gmra.mxu0 %vm48_vm0, %v1200_v22 }
  0x91   :  { %v1347_v36 = vpop.f32.mrf.mxu3  ;;  %v1349_v37 = vpop.f32.mrf.mxu2  ;;  %979 = vmatmul.msk.f32.gmra.mxu1 %vm48_vm0, %v1200_v22 }
  0x92   :  { %1869 = vst [vmem:[#allocation6_spill] sm:$0xff] %v1347_v36 }
  0x95   :  { %v1359_v38 = vpop.f32.mrf.mxu0 }
  0x96   :  { %948 = vmatmul.msk.f32.gmra.mxu3 %vm48_vm0, %v1213_v23  ;;  %996 = vmatmul.msk.f32.gmra.mxu2 %vm48_vm0, %v1213_v23  ;;  %v1361_v39 = vpop.f32.mrf.mxu1 }
  0x98   :  { %964 = vmatmul.msk.f32.gmra.mxu0 %vm48_vm0, %v1213_v23 }
  0x99   :  { %v1363_v40 = vpop.f32.mrf.mxu3  ;;  %v1365_v41 = vpop.f32.mrf.mxu2  ;;  %980 = vmatmul.msk.f32.gmra.mxu1 %vm48_vm0, %v1213_v23 }
  0x9a   :  { %1870 = vst [vmem:[#allocation7_spill] sm:$0xff] %v1363_v40 }
  0x9d   :  { %v1375_v42 = vpop.f32.mrf.mxu0 }
  0x9e   :  { %949 = vmatmul.msk.f32.gmra.mxu3 %vm48_vm0, %v1229_v25  ;;  %997 = vmatmul.msk.f32.gmra.mxu2 %vm48_vm0, %v1229_v25  ;;  %v1377_v43 = vpop.f32.mrf.mxu1 }
  0xa0   :  { %965 = vmatmul.msk.f32.gmra.mxu0 %vm48_vm0, %v1229_v25 }
  0xa1   :  { %v1379_v44 = vpop.f32.mrf.mxu3  ;;  %v1381_v45 = vpop.f32.mrf.mxu2  ;;  %981 = vmatmul.msk.f32.gmra.mxu1 %vm48_vm0, %v1229_v25 }
  0xa2   :  { %1871 = vst [vmem:[#allocation8_spill] sm:$0xff] %v1379_v44  ;;  %v1570_v44 = vld [vmem:[%s1866_s3 + $0x6] ss:$0 sm:$0xff] }
  0xa5   :  { %v1391_v46 = vpop.f32.mrf.mxu0 }
  0xa6   :  { %950 = vmatmul.msk.f32.gmra.mxu3 %vm48_vm0, %v1242_v26  ;;  %998 = vmatmul.msk.f32.gmra.mxu2 %vm48_vm0, %v1242_v26  ;;  %v1393_v47 = vpop.f32.mrf.mxu1 }
  0xa8   :  { %966 = vmatmul.msk.f32.gmra.mxu0 %vm48_vm0, %v1242_v26 }
  0xa9   :  { %v1395_v48 = vpop.f32.mrf.mxu3  ;;  %v1397_v49 = vpop.f32.mrf.mxu2  ;;  %982 = vmatmul.msk.f32.gmra.mxu1 %vm48_vm0, %v1242_v26 }
  0xad   :  { %v1407_v50 = vpop.f32.mrf.mxu0 }
  0xae   :  { %951 = vmatmul.msk.f32.gmra.mxu3 %vm48_vm0, %v1255_v27  ;;  %999 = vmatmul.msk.f32.gmra.mxu2 %vm48_vm0, %v1255_v27  ;;  %v1409_v51 = vpop.f32.mrf.mxu1 }
  0xb0   :  { %967 = vmatmul.msk.f32.gmra.mxu0 %vm48_vm0, %v1255_v27 }
  0xb1   :  { %v1411_v52 = vpop.f32.mrf.mxu3  ;;  %v1413_v53 = vpop.f32.mrf.mxu2  ;;  %983 = vmatmul.msk.f32.gmra.mxu1 %vm48_vm0, %v1255_v27 }
  0xb2   :  { %1872 = vst [vmem:[#allocation9_spill] sm:$0xff] %v1411_v52 }
  0xb5   :  { %v1423_v54 = vpop.f32.mrf.mxu0 }
  0xb6   :  { %952 = vmatmul.msk.f32.gmra.mxu3 %vm48_vm0, %v1268_v28  ;;  %1000 = vmatmul.msk.f32.gmra.mxu2 %vm48_vm0, %v1268_v28  ;;  %v1425_v55 = vpop.f32.mrf.mxu1 }
  0xb8   :  { %968 = vmatmul.msk.f32.gmra.mxu0 %vm48_vm0, %v1268_v28 }
  0xb9   :  { %v1427_v56 = vpop.f32.mrf.mxu3  ;;  %v1429_v57 = vpop.f32.mrf.mxu2  ;;  %984 = vmatmul.msk.f32.gmra.mxu1 %vm48_vm0, %v1268_v28  ;;  %v1558_v28 = vld [vmem:[%s1866_s3] ss:$0 sm:$0xff] }
  0xba   :  { %1873 = vst [vmem:[#allocation10_spill] sm:$0xff] %v1427_v56 }
  0xbd   :  { %v1439_v58 = vpop.f32.mrf.mxu0 }
  0xbe   :  { %953 = vmatmul.msk.f32.gmra.mxu3 %vm48_vm0, %v1281_v29  ;;  %1001 = vmatmul.msk.f32.gmra.mxu2 %vm48_vm0, %v1281_v29  ;;  %v1441_v59 = vpop.f32.mrf.mxu1 }
  0xc0   :  { %969 = vmatmul.msk.f32.gmra.mxu0 %vm48_vm0, %v1281_v29 }
  0xc1   :  { %v1443_v60 = vpop.f32.mrf.mxu3  ;;  %v1445_v61 = vpop.f32.mrf.mxu2  ;;  %985 = vmatmul.msk.f32.gmra.mxu1 %vm48_vm0, %v1281_v29  ;;  %v1565_v29 = vld [vmem:[%s1866_s3 + $0x7] ss:$0 sm:$0xff] }
  0xc2   :  { %1874 = vst [vmem:[#allocation11_spill] sm:$0xff] %v1443_v60 }
  0xc5   :  { %v1455_v62 = vpop.f32.mrf.mxu0 }
  0xc6   :  { %954 = vmatmul.msk.f32.gmra.mxu3 %vm48_vm0, %v1088_v4  ;;  %1002 = vmatmul.msk.f32.gmra.mxu2 %vm48_vm0, %v1088_v4  ;;  %v1457_v63 = vpop.f32.mrf.mxu1 }
  0xc8   :  { %970 = vmatmul.msk.f32.gmra.mxu0 %vm48_vm0, %v1088_v4 }
  0xc9   :  { %v1459_v0 = vpop.f32.mrf.mxu2  ;;  %v1461_v1 = vpop.f32.mrf.mxu3  ;;  %986 = vmatmul.msk.f32.gmra.mxu1 %vm48_vm0, %v1088_v4 }
  0xcd   :  { %v1471_v2 = vpop.f32.mrf.mxu0 }
  0xce   :  { %955 = vmatmul.msk.f32.gmra.mxu3 %vm48_vm0, %v1121_v11  ;;  %1003 = vmatmul.msk.f32.gmra.mxu2 %vm48_vm0, %v1121_v11  ;;  %v1473_v3 = vpop.f32.mrf.mxu1 }
  0xd0   :  { %971 = vmatmul.msk.f32.gmra.mxu0 %vm48_vm0, %v1121_v11 }
  0xd1   :  { %v1475_v5 = vpop.f32.mrf.mxu2  ;;  %v1477_v6 = vpop.f32.mrf.mxu3  ;;  %987 = vmatmul.msk.f32.gmra.mxu1 %vm48_vm0, %v1121_v11 }
  0xd2   :  { %1875 = vst [vmem:[#allocation12_spill] sm:$0xff] %v1477_v6 }
  0xd5   :  { %v1487_v4 = vpop.f32.mrf.mxu0 }
  0xd6   :  { %956 = vmatmul.msk.f32.gmra.mxu3 %vm48_vm0, %v1139_v13  ;;  %1004 = vmatmul.msk.f32.gmra.mxu2 %vm48_vm0, %v1139_v13  ;;  %v1489_v7 = vpop.f32.mrf.mxu1 }
  0xd8   :  { %972 = vmatmul.msk.f32.gmra.mxu0 %vm48_vm0, %v1139_v13 }
  0xd9   :  { %v1491_v8 = vpop.f32.mrf.mxu2  ;;  %v1493_v9 = vpop.f32.mrf.mxu3  ;;  %988 = vmatmul.msk.f32.gmra.mxu1 %vm48_vm0, %v1139_v13  ;;  %v552_v13 = vld [vmem:[%s1865_s2] sm:$0xff] }
  0xda   :  { %1876 = vst [vmem:[#allocation13_spill] sm:$0xff] %v1493_v9  ;;  %v1518_v15 = vperm.slane %v552_v13, 4  ;;  %v1520_v16 = vperm.slane %v552_v13, 5  ;;  %v1542_v21 = vperm.slane %v552_v13, 1  ;;  %v1544_v22 = vperm.slane %v552_v13, 2 }
  0xdb   :  { %v1546_v23 = vperm.slane %v552_v13, 3  ;;  %v1553_v27 = vperm.slane %v552_v13, 6 }
  0xdc   :  { %vm569_vm5 = vcmp.gt.f32.partialorder %v1329_v31, %v1542_v21  ;;  %vm570_vm6 = vcmp.gt.f32.partialorder %v1333_v33, %v1544_v22  ;;  %vm576_vm12 = vcmp.gt.f32.partialorder %v1345_v35, %v1542_v21  ;;  %vm577_vm13 = vcmp.gt.f32.partialorder %v1349_v37, %v1544_v22 }
  0xdd   :  { %v1503_v10 = vpop.f32.mrf.mxu0 }
  0xde   :  { %957 = vmatmul.msk.f32.gmra.mxu3 %vm48_vm0, %v1166_v18  ;;  %1005 = vmatmul.msk.f32.gmra.mxu2 %vm48_vm0, %v1166_v18  ;;  %v1505_v11 = vpop.f32.mrf.mxu1 }
  0xe0   :  { %973 = vmatmul.msk.f32.gmra.mxu0 %vm48_vm0, %v1166_v18 }
  0xe1   :  { %v1507_v12 = vpop.f32.mrf.mxu2  ;;  %v1509_v14 = vpop.f32.mrf.mxu3  ;;  %989 = vmatmul.msk.f32.gmra.mxu1 %vm48_vm0, %v1166_v18  ;;  %v1535_v18 = vld [vmem:[%s1866_s3 + $0x5] ss:$0 sm:$0xff]  ;;  %s1047_s3 = smov [#allocation2]  }
  0xe2   :  { %1877 = vst [vmem:[#allocation14_spill] sm:$0xff] %v1509_v14  ;;  %v1572_v14 = vperm.slane %v552_v13, 0  ;;  %s883_s12 = sshll.u32 %s1047_s3, 4  ;;  %s884_s12 = int_to_ptr.vmem [resolvable:$true] %s883_s12 }
  0xe4   :  { %vm568_vm7 = vcmp.gt.f32.partialorder %v1327_v30, %v1572_v14  ;;  %vm575_vm14 = vcmp.gt.f32.partialorder %v1343_v34, %v1572_v14 }
  0xe5   :  { %v374_v25 = vpop.f32.mrf.mxu0 }
  0xe6   :  { %v439_v26 = vpop.f32.mrf.mxu1  ;;  %vm572_vm1 = vcmp.gt.f32.partialorder %v374_v25, %v1518_v15 }
  0xe7   :  { %vm573_vm2 = vcmp.gt.f32.partialorder %v439_v26, %v1520_v16  ;;  %v688_v40 = vsel %vm572_vm1, %v1525_v17, %v1530_v19 }
  0xe8   :  { %v776_v25 = vsel %vm573_vm2, %v1535_v18, %v1540_v20 }
  0xe9   :  { %v309_v60 = vpop.f32.mrf.mxu3  ;;  %v504_v26 = vpop.f32.mrf.mxu2 }
  0xea   :  { %vm571_vm3 = vcmp.gt.f32.partialorder %v309_v60, %v1546_v23  ;;  %vm574_vm4 = vcmp.gt.f32.partialorder %v504_v26, %v1553_v27 }
  0xeb   :  { %v712_v13 = vsel %vm571_vm3, %v1551_v24, %v1558_v28  ;;  %v752_v9 = vsel %vm574_vm4, %v1565_v29, %v1570_v44  ;;  %vm583_vm3 = vcmp.gt.f32.partialorder %v1361_v39, %v1542_v21  ;;  %vm584_vm4 = vcmp.gt.f32.partialorder %v1365_v41, %v1544_v22 }
  0xec   :  { %v728_v56 = vsel %vm569_vm5, %v688_v40, %v712_v13  ;;  %v792_v36 = vsel %vm570_vm6, %v752_v9, %v776_v25  ;;  %vm582_vm5 = vcmp.gt.f32.partialorder %v1359_v38, %v1572_v14 }
  0xed   :  { %v808_v60 = vsel %vm568_vm7, %v792_v36, %v728_v56  ;;  %v377_v26 = vpop.f32.mrf.mxu0 }
  0xee   :  { %824 = vxpose.xlu0.b32.start [1/16] %v808_v60, 128  ;;  %v442_v6 = vpop.f32.mrf.mxu1  ;;  %vm579_vm8 = vcmp.gt.f32.partialorder %v377_v26, %v1518_v15 }
  0xef   :  { %vm580_vm9 = vcmp.gt.f32.partialorder %v442_v6, %v1520_v16  ;;  %v689_v33 = vsel %vm579_vm8, %v1525_v17, %v1530_v19 }
  0xf0   :  { %v777_v52 = vsel %vm580_vm9, %v1535_v18, %v1540_v20 }
  0xf1   :  { %v312_v31 = vpop.f32.mrf.mxu3  ;;  %v507_v32 = vpop.f32.mrf.mxu2 }
  0xf2   :  { %vm578_vm10 = vcmp.gt.f32.partialorder %v312_v31, %v1546_v23  ;;  %vm581_vm11 = vcmp.gt.f32.partialorder %v507_v32, %v1553_v27 }
  0xf3   :  { %v713_v30 = vsel %vm578_vm10, %v1551_v24, %v1558_v28  ;;  %v753_v36 = vsel %vm581_vm11, %v1565_v29, %v1570_v44  ;;  %vm590_vm10 = vcmp.gt.f32.partialorder %v1377_v43, %v1542_v21  ;;  %vm591_vm11 = vcmp.gt.f32.partialorder %v1381_v45, %v1544_v22 }
  0xf4   :  { %v729_v40 = vsel %vm576_vm12, %v689_v33, %v713_v30  ;;  %v793_v56 = vsel %vm577_vm13, %v753_v36, %v777_v52  ;;  %vm589_vm12 = vcmp.gt.f32.partialorder %v1375_v42, %v1572_v14 }
  0xf5   :  { %v809_v6 = vsel %vm575_vm14, %v793_v56, %v729_v40  ;;  %v380_v32 = vpop.f32.mrf.mxu0 }
  0xf6   :  { %825 = vxpose.xlu0.b32.cont [2/16] %v809_v6, 128  ;;  %v445_v9 = vpop.f32.mrf.mxu1  ;;  %vm586_vm15 = vcmp.gt.f32.partialorder %v380_v32, %v1518_v15 }
  0xf7   :  { %vm587_vm0 = vcmp.gt.f32.partialorder %v445_v9, %v1520_v16  ;;  %v690_v37 = vsel %vm586_vm15, %v1525_v17, %v1530_v19 }
  0xf8   :  { %v778_v25 = vsel %vm587_vm0, %v1535_v18, %v1540_v20 }
  0xf9   :  { %v315_v35 = vpop.f32.mrf.mxu3  ;;  %v510_v13 = vpop.f32.mrf.mxu2 }
  0xfa   :  { %vm585_vm1 = vcmp.gt.f32.partialorder %v315_v35, %v1546_v23  ;;  %vm588_vm2 = vcmp.gt.f32.partialorder %v510_v13, %v1553_v27 }
  0xfb   :  { %v714_v34 = vsel %vm585_vm1, %v1551_v24, %v1558_v28  ;;  %v754_v52 = vsel %vm588_vm2, %v1565_v29, %v1570_v44  ;;  %vm597_vm1 = vcmp.gt.f32.partialorder %v1393_v47, %v1542_v21  ;;  %vm598_vm2 = vcmp.gt.f32.partialorder %v1397_v49, %v1544_v22 }
  0xfc   :  { %v730_v60 = vsel %vm583_vm3, %v690_v37, %v714_v34  ;;  %v794_v26 = vsel %vm584_vm4, %v754_v52, %v778_v25  ;;  %vm596_vm3 = vcmp.gt.f32.partialorder %v1391_v46, %v1572_v14 }
  0xfd   :  { %v810_v31 = vsel %vm582_vm5, %v794_v26, %v730_v60  ;;  %v383_v33 = vpop.f32.mrf.mxu0 }
  0xfe   :  { %826 = vxpose.xlu0.b32.cont [3/16] %v810_v31, 128  ;;  %v448_v30 = vpop.f32.mrf.mxu1  ;;  %vm593_vm6 = vcmp.gt.f32.partialorder %v383_v33, %v1518_v15 }
  0xff   :  { %vm594_vm7 = vcmp.gt.f32.partialorder %v448_v30, %v1520_v16  ;;  %v691_v41 = vsel %vm593_vm6, %v1525_v17, %v1530_v19 }
 0x100   :  { %v779_v36 = vsel %vm594_vm7, %v1535_v18, %v1540_v20 }
 0x101   :  { %v318_v39 = vpop.f32.mrf.mxu3  ;;  %v513_v40 = vpop.f32.mrf.mxu2 }
 0x102   :  { %vm592_vm8 = vcmp.gt.f32.partialorder %v318_v39, %v1546_v23  ;;  %vm595_vm9 = vcmp.gt.f32.partialorder %v513_v40, %v1553_v27 }
 0x103   :  { %v715_v38 = vsel %vm592_vm8, %v1551_v24, %v1558_v28  ;;  %v755_v56 = vsel %vm595_vm9, %v1565_v29, %v1570_v44  ;;  %vm604_vm8 = vcmp.gt.f32.partialorder %v1409_v51, %v1542_v21  ;;  %vm605_vm9 = vcmp.gt.f32.partialorder %v1413_v53, %v1544_v22 }
 0x104   :  { %v731_v6 = vsel %vm590_vm10, %v691_v41, %v715_v38  ;;  %v795_v32 = vsel %vm591_vm11, %v755_v56, %v779_v36  ;;  %vm603_vm10 = vcmp.gt.f32.partialorder %v1407_v50, %v1572_v14 }
 0x105   :  { %v811_v9 = vsel %vm589_vm12, %v795_v32, %v731_v6  ;;  %v386_v35 = vpop.f32.mrf.mxu0 }
 0x106   :  { %827 = vxpose.xlu0.b32.cont [4/16] %v811_v9, 128  ;;  %v451_v37 = vpop.f32.mrf.mxu1  ;;  %vm600_vm13 = vcmp.gt.f32.partialorder %v386_v35, %v1518_v15 }
 0x107   :  { %vm601_vm14 = vcmp.gt.f32.partialorder %v451_v37, %v1520_v16  ;;  %v692_v45 = vsel %vm600_vm13, %v1525_v17, %v1530_v19 }
 0x108   :  { %v780_v25 = vsel %vm601_vm14, %v1535_v18, %v1540_v20 }
 0x109   :  { %v321_v43 = vpop.f32.mrf.mxu3  ;;  %v516_v13 = vpop.f32.mrf.mxu2 }
 0x10a   :  { %vm599_vm15 = vcmp.gt.f32.partialorder %v321_v43, %v1546_v23  ;;  %vm602_vm0 = vcmp.gt.f32.partialorder %v516_v13, %v1553_v27 }
 0x10b   :  { %v716_v42 = vsel %vm599_vm15, %v1551_v24, %v1558_v28  ;;  %v756_v34 = vsel %vm602_vm0, %v1565_v29, %v1570_v44  ;;  %vm611_vm15 = vcmp.gt.f32.partialorder %v1425_v55, %v1542_v21  ;;  %vm612_vm0 = vcmp.gt.f32.partialorder %v1429_v57, %v1544_v22 }
 0x10c   :  { %v732_v52 = vsel %vm597_vm1, %v692_v45, %v716_v42  ;;  %v796_v60 = vsel %vm598_vm2, %v756_v34, %v780_v25  ;;  %vm610_vm1 = vcmp.gt.f32.partialorder %v1423_v54, %v1572_v14 }
 0x10d   :  { %v812_v26 = vsel %vm596_vm3, %v796_v60, %v732_v52  ;;  %v389_v31 = vpop.f32.mrf.mxu0 }
 0x10e   :  { %828 = vxpose.xlu0.b32.cont [5/16] %v812_v26, 128  ;;  %v454_v33 = vpop.f32.mrf.mxu1  ;;  %vm607_vm4 = vcmp.gt.f32.partialorder %v389_v31, %v1518_v15 }
 0x10f   :  { %vm608_vm5 = vcmp.gt.f32.partialorder %v454_v33, %v1520_v16  ;;  %v693_v49 = vsel %vm607_vm4, %v1525_v17, %v1530_v19 }
 0x110   :  { %v781_v30 = vsel %vm608_vm5, %v1535_v18, %v1540_v20 }
 0x111   :  { %v324_v47 = vpop.f32.mrf.mxu3  ;;  %v519_v39 = vpop.f32.mrf.mxu2 }
 0x112   :  { %vm606_vm6 = vcmp.gt.f32.partialorder %v324_v47, %v1546_v23  ;;  %vm609_vm7 = vcmp.gt.f32.partialorder %v519_v39, %v1553_v27 }
 0x113   :  { %v717_v46 = vsel %vm606_vm6, %v1551_v24, %v1558_v28  ;;  %v757_v41 = vsel %vm609_vm7, %v1565_v29, %v1570_v44  ;;  %vm618_vm6 = vcmp.gt.f32.partialorder %v1441_v59, %v1542_v21  ;;  %vm619_vm7 = vcmp.gt.f32.partialorder %v1445_v61, %v1544_v22 }
 0x114   :  { %v733_v36 = vsel %vm604_vm8, %v693_v49, %v717_v46  ;;  %v797_v40 = vsel %vm605_vm9, %v757_v41, %v781_v30  ;;  %vm617_vm8 = vcmp.gt.f32.partialorder %v1439_v58, %v1572_v14 }
 0x115   :  { %v813_v38 = vsel %vm603_vm10, %v797_v40, %v733_v36  ;;  %v392_v56 = vpop.f32.mrf.mxu0 }
 0x116   :  { %829 = vxpose.xlu0.b32.cont [6/16] %v813_v38, 128  ;;  %v457_v6 = vpop.f32.mrf.mxu1  ;;  %vm614_vm11 = vcmp.gt.f32.partialorder %v392_v56, %v1518_v15 }
 0x117   :  { %vm615_vm12 = vcmp.gt.f32.partialorder %v457_v6, %v1520_v16  ;;  %v694_v53 = vsel %vm614_vm11, %v1525_v17, %v1530_v19 }
 0x118   :  { %v782_v32 = vsel %vm615_vm12, %v1535_v18, %v1540_v20 }
 0x119   :  { %v327_v51 = vpop.f32.mrf.mxu3  ;;  %v522_v9 = vpop.f32.mrf.mxu2 }
 0x11a   :  { %vm613_vm13 = vcmp.gt.f32.partialorder %v327_v51, %v1546_v23  ;;  %vm616_vm14 = vcmp.gt.f32.partialorder %v522_v9, %v1553_v27 }
 0x11b   :  { %v718_v50 = vsel %vm613_vm13, %v1551_v24, %v1558_v28  ;;  %v758_v35 = vsel %vm616_vm14, %v1565_v29, %v1570_v44  ;;  %vm625_vm13 = vcmp.gt.f32.partialorder %v1457_v63, %v1542_v21  ;;  %vm626_vm14 = vcmp.gt.f32.partialorder %v1459_v0, %v1544_v22 }
 0x11c   :  { %v734_v37 = vsel %vm611_vm15, %v694_v53, %v718_v50  ;;  %v798_v43 = vsel %vm612_vm0, %v758_v35, %v782_v32  ;;  %vm624_vm15 = vcmp.gt.f32.partialorder %v1455_v62, %v1572_v14 }
 0x11d   :  { %v814_v45 = vsel %vm610_vm1, %v798_v43, %v734_v37  ;;  %v395_v25 = vpop.f32.mrf.mxu0 }
 0x11e   :  { %830 = vxpose.xlu0.b32.cont [7/16] %v814_v45, 128  ;;  %v460_v13 = vpop.f32.mrf.mxu1  ;;  %vm621_vm2 = vcmp.gt.f32.partialorder %v395_v25, %v1518_v15 }
 0x11f   :  { %vm622_vm3 = vcmp.gt.f32.partialorder %v460_v13, %v1520_v16  ;;  %v695_v57 = vsel %vm621_vm2, %v1525_v17, %v1530_v19 }
 0x120   :  { %v783_v42 = vsel %vm622_vm3, %v1535_v18, %v1540_v20 }
 0x121   :  { %v330_v55 = vpop.f32.mrf.mxu3  ;;  %v525_v34 = vpop.f32.mrf.mxu2 }
 0x122   :  { %vm620_vm4 = vcmp.gt.f32.partialorder %v330_v55, %v1546_v23  ;;  %vm623_vm5 = vcmp.gt.f32.partialorder %v525_v34, %v1553_v27 }
 0x123   :  { %v719_v54 = vsel %vm620_vm4, %v1551_v24, %v1558_v28  ;;  %v759_v52 = vsel %vm623_vm5, %v1565_v29, %v1570_v44  ;;  %vm632_vm4 = vcmp.gt.f32.partialorder %v1473_v3, %v1542_v21  ;;  %vm633_vm5 = vcmp.gt.f32.partialorder %v1475_v5, %v1544_v22 }
 0x124   :  { %v735_v60 = vsel %vm618_vm6, %v695_v57, %v719_v54  ;;  %v799_v26 = vsel %vm619_vm7, %v759_v52, %v783_v42  ;;  %vm631_vm6 = vcmp.gt.f32.partialorder %v1471_v2, %v1572_v14 }
 0x125   :  { %v815_v31 = vsel %vm617_vm8, %v799_v26, %v735_v60  ;;  %v398_v33 = vpop.f32.mrf.mxu0 }
 0x126   :  { %831 = vxpose.xlu0.b32.cont [8/16] %v815_v31, 128  ;;  %v463_v47 = vpop.f32.mrf.mxu1  ;;  %vm628_vm9 = vcmp.gt.f32.partialorder %v398_v33, %v1518_v15 }
 0x127   :  { %vm629_vm10 = vcmp.gt.f32.partialorder %v463_v47, %v1520_v16  ;;  %v696_v61 = vsel %vm628_vm9, %v1525_v17, %v1530_v19 }
 0x128   :  { %v784_v49 = vsel %vm629_vm10, %v1535_v18, %v1540_v20 }
 0x129   :  { %v333_v59 = vpop.f32.mrf.mxu3  ;;  %v528_v30 = vpop.f32.mrf.mxu2 }
 0x12a   :  { %vm627_vm11 = vcmp.gt.f32.partialorder %v333_v59, %v1546_v23  ;;  %vm630_vm12 = vcmp.gt.f32.partialorder %v528_v30, %v1553_v27  ;;  %v1878_v30 = vld [vmem:[#allocation5_spill] sm:$0xff] }
 0x12b   :  { %v720_v58 = vsel %vm627_vm11, %v1551_v24, %v1558_v28  ;;  %v760_v39 = vsel %vm630_vm12, %v1565_v29, %v1570_v44  ;;  %vm639_vm11 = vcmp.gt.f32.partialorder %v1489_v7, %v1542_v21  ;;  %vm640_vm12 = vcmp.gt.f32.partialorder %v1491_v8, %v1544_v22 }
 0x12c   :  { %v736_v46 = vsel %vm625_vm13, %v696_v61, %v720_v58  ;;  %v800_v41 = vsel %vm626_vm14, %v760_v39, %v784_v49  ;;  %vm638_vm13 = vcmp.gt.f32.partialorder %v1487_v4, %v1572_v14 }
 0x12d   :  { %v816_v36 = vsel %vm624_vm15, %v800_v41, %v736_v46  ;;  %v401_v40 = vpop.f32.mrf.mxu0 }
 0x12e   :  { %832 = vxpose.xlu0.b32.cont [9/16] %v816_v36, 128  ;;  %v466_v38 = vpop.f32.mrf.mxu1  ;;  %vm635_vm0 = vcmp.gt.f32.partialorder %v401_v40, %v1518_v15 }
 0x12f   :  { %vm636_vm1 = vcmp.gt.f32.partialorder %v466_v38, %v1520_v16  ;;  %v697_v0 = vsel %vm635_vm0, %v1525_v17, %v1530_v19 }
 0x130   :  { %v785_v56 = vsel %vm636_vm1, %v1535_v18, %v1540_v20 }
 0x131   :  { %v336_v63 = vpop.f32.mrf.mxu3  ;;  %v531_v6 = vpop.f32.mrf.mxu2 }
 0x132   :  { %vm634_vm2 = vcmp.gt.f32.partialorder %v336_v63, %v1546_v23  ;;  %vm637_vm3 = vcmp.gt.f32.partialorder %v531_v6, %v1553_v27  ;;  %v1879_v63 = vld [vmem:[#allocation9_spill] sm:$0xff] }
 0x133   :  { %v721_v62 = vsel %vm634_vm2, %v1551_v24, %v1558_v28  ;;  %v761_v51 = vsel %vm637_vm3, %v1565_v29, %v1570_v44  ;;  %vm646_vm2 = vcmp.gt.f32.partialorder %v1505_v11, %v1542_v21  ;;  %vm647_vm3 = vcmp.gt.f32.partialorder %v1507_v12, %v1544_v22 }
 0x134   :  { %v737_v53 = vsel %vm632_vm4, %v697_v0, %v721_v62  ;;  %v801_v32 = vsel %vm633_vm5, %v761_v51, %v785_v56  ;;  %vm645_vm4 = vcmp.gt.f32.partialorder %v1503_v10, %v1572_v14  ;;  %v1880_v0 = vld [vmem:[#allocation12_spill] sm:$0xff]  ;;  %v1881_v62 = vld [vmem:[#allocation6_spill] sm:$0xff] }
 0x135   :  { %v817_v9 = vsel %vm631_vm6, %v801_v32, %v737_v53  ;;  %v404_v50 = vpop.f32.mrf.mxu0 }
 0x136   :  { %833 = vxpose.xlu0.b32.cont [10/16] %v817_v9, 128  ;;  %v469_v35 = vpop.f32.mrf.mxu1  ;;  %vm642_vm7 = vcmp.gt.f32.partialorder %v404_v50, %v1518_v15 }
 0x137   :  { %vm643_vm8 = vcmp.gt.f32.partialorder %v469_v35, %v1520_v16  ;;  %v698_v5 = vsel %vm642_vm7, %v1525_v17, %v1530_v19 }
 0x138   :  { %v786_v37 = vsel %vm643_vm8, %v1535_v18, %v1540_v20 }
 0x139   :  { %v339_v3 = vpop.f32.mrf.mxu3  ;;  %v534_v43 = vpop.f32.mrf.mxu2 }
 0x13a   :  { %vm641_vm9 = vcmp.gt.f32.partialorder %v339_v3, %v1546_v23  ;;  %vm644_vm10 = vcmp.gt.f32.partialorder %v534_v43, %v1553_v27  ;;  %v1882_v43 = vld [vmem:[#allocation10_spill] sm:$0xff] }
 0x13b   :  { %v722_v2 = vsel %vm641_vm9, %v1551_v24, %v1558_v28  ;;  %v762_v45 = vsel %vm644_vm10, %v1565_v29, %v1570_v44  ;;  %vm653_vm9 = vcmp.gt.f32.partialorder %v1395_v48, %v1542_v21  ;;  %vm654_vm10 = vcmp.gt.f32.partialorder %v1461_v1, %v1544_v22 }
 0x13c   :  { %v738_v25 = vsel %vm639_vm11, %v698_v5, %v722_v2  ;;  %v802_v13 = vsel %vm640_vm12, %v762_v45, %v786_v37  ;;  %vm652_vm11 = vcmp.gt.f32.partialorder %v1878_v30, %v1572_v14  ;;  %v1883_v2 = vld [vmem:[#allocation13_spill] sm:$0xff] }
 0x13d   :  { %v818_v55 = vsel %vm638_vm13, %v802_v13, %v738_v25  ;;  %v407_v57 = vpop.f32.mrf.mxu0  ;;  %v1884_v13 = vld [vmem:[#allocation7_spill] sm:$0xff] }
 0x13e   :  { %834 = vxpose.xlu0.b32.cont [11/16] %v818_v55, 128  ;;  %v472_v42 = vpop.f32.mrf.mxu1  ;;  %vm649_vm14 = vcmp.gt.f32.partialorder %v407_v57, %v1518_v15 }
 0x13f   :  { %vm650_vm15 = vcmp.gt.f32.partialorder %v472_v42, %v1520_v16  ;;  %v699_v8 = vsel %vm649_vm14, %v1525_v17, %v1530_v19 }
 0x140   :  { %v787_v34 = vsel %vm650_vm15, %v1535_v18, %v1540_v20 }
 0x141   :  { %v342_v7 = vpop.f32.mrf.mxu3  ;;  %v537_v54 = vpop.f32.mrf.mxu2 }
 0x142   :  { %vm648_vm0 = vcmp.gt.f32.partialorder %v342_v7, %v1546_v23  ;;  %vm651_vm1 = vcmp.gt.f32.partialorder %v537_v54, %v1553_v27 }
 0x143   :  { %v723_v4 = vsel %vm648_vm0, %v1551_v24, %v1558_v28  ;;  %v763_v52 = vsel %vm651_vm1, %v1565_v29, %v1570_v44  ;;  %vm660_vm0 = vcmp.gt.f32.partialorder %v1879_v63, %v1542_v21  ;;  %vm661_vm1 = vcmp.gt.f32.partialorder %v1880_v0, %v1544_v22 }
 0x144   :  { %v739_v60 = vsel %vm646_vm2, %v699_v8, %v723_v4  ;;  %v803_v26 = vsel %vm647_vm3, %v763_v52, %v787_v34  ;;  %vm659_vm2 = vcmp.gt.f32.partialorder %v1881_v62, %v1572_v14 }
 0x145   :  { %v819_v31 = vsel %vm645_vm4, %v803_v26, %v739_v60  ;;  %v410_v33 = vpop.f32.mrf.mxu0  ;;  %v1885_v60 = vld [vmem:[#allocation11_spill] sm:$0xff]  ;;  %v1886_v26 = vld [vmem:[#allocation14_spill] sm:$0xff] }
 0x146   :  { %835 = vxpose.xlu0.b32.cont [12/16] %v819_v31, 128  ;;  %v475_v47 = vpop.f32.mrf.mxu1  ;;  %vm656_vm5 = vcmp.gt.f32.partialorder %v410_v33, %v1518_v15 }
 0x147   :  { %vm657_vm6 = vcmp.gt.f32.partialorder %v475_v47, %v1520_v16  ;;  %v700_v12 = vsel %vm656_vm5, %v1525_v17, %v1530_v19 }
 0x148   :  { %v788_v59 = vsel %vm657_vm6, %v1535_v18, %v1540_v20 }
 0x149   :  { %v345_v11 = vpop.f32.mrf.mxu3  ;;  %v540_v61 = vpop.f32.mrf.mxu2 }
 0x14a   :  { %vm655_vm7 = vcmp.gt.f32.partialorder %v345_v11, %v1546_v23  ;;  %vm658_vm8 = vcmp.gt.f32.partialorder %v540_v61, %v1553_v27 }
 0x14b   :  { %v724_v10 = vsel %vm655_vm7, %v1551_v24, %v1558_v28  ;;  %v764_v49 = vsel %vm658_vm8, %v1565_v29, %v1570_v44  ;;  %vm667_vm7 = vcmp.gt.f32.partialorder %v1882_v43, %v1542_v21  ;;  %vm668_vm8 = vcmp.gt.f32.partialorder %v1883_v2, %v1544_v22 }
 0x14c   :  { %v740_v58 = vsel %vm653_vm9, %v700_v12, %v724_v10  ;;  %v804_v39 = vsel %vm654_vm10, %v764_v49, %v788_v59  ;;  %vm666_vm9 = vcmp.gt.f32.partialorder %v1884_v13, %v1572_v14 }
 0x14d   :  { %v820_v46 = vsel %vm652_vm11, %v804_v39, %v740_v58  ;;  %v413_v41 = vpop.f32.mrf.mxu0 }
 0x14e   :  { %836 = vxpose.xlu0.b32.cont [13/16] %v820_v46, 128  ;;  %v478_v36 = vpop.f32.mrf.mxu1  ;;  %vm663_vm12 = vcmp.gt.f32.partialorder %v413_v41, %v1518_v15 }
 0x14f   :  { %vm664_vm13 = vcmp.gt.f32.partialorder %v478_v36, %v1520_v16  ;;  %v701_v1 = vsel %vm663_vm12, %v1525_v17, %v1530_v19 }
 0x150   :  { %v789_v40 = vsel %vm664_vm13, %v1535_v18, %v1540_v20 }
 0x151   :  { %v348_v48 = vpop.f32.mrf.mxu3  ;;  %v543_v38 = vpop.f32.mrf.mxu2 }
 0x152   :  { %vm662_vm14 = vcmp.gt.f32.partialorder %v348_v48, %v1546_v23  ;;  %vm665_vm15 = vcmp.gt.f32.partialorder %v543_v38, %v1553_v27 }
 0x153   :  { %v725_v56 = vsel %vm662_vm14, %v1551_v24, %v1558_v28  ;;  %v765_v6 = vsel %vm665_vm15, %v1565_v29, %v1570_v44  ;;  %vm674_vm14 = vcmp.gt.f32.partialorder %v1885_v60, %v1542_v21  ;;  %vm675_vm15 = vcmp.gt.f32.partialorder %v1886_v26, %v1544_v22 }
 0x154   :  { %v741_v51 = vsel %vm660_vm0, %v701_v1, %v725_v56  ;;  %v805_v53 = vsel %vm661_vm1, %v765_v6, %v789_v40 }
 0x155   :  { %v821_v32 = vsel %vm659_vm2, %v805_v53, %v741_v51  ;;  %v416_v9 = vpop.f32.mrf.mxu0 }
 0x156   :  { %837 = vxpose.xlu0.b32.cont [14/16] %v821_v32, 128  ;;  %v481_v50 = vpop.f32.mrf.mxu1  ;;  %vm670_vm3 = vcmp.gt.f32.partialorder %v416_v9, %v1518_v15 }
 0x157   :  { %vm671_vm4 = vcmp.gt.f32.partialorder %v481_v50, %v1520_v16  ;;  %v702_v3 = vsel %vm670_vm3, %v1525_v17, %v1530_v19 }
 0x158   :  { %v790_v5 = vsel %vm671_vm4, %v1535_v18, %v1540_v20 }
 0x159   :  { %v351_v35 = vpop.f32.mrf.mxu3  ;;  %v546_v37 = vpop.f32.mrf.mxu2 }
 0x15a   :  { %vm669_vm5 = vcmp.gt.f32.partialorder %v351_v35, %v1546_v23  ;;  %vm672_vm6 = vcmp.gt.f32.partialorder %v546_v37, %v1553_v27 }
 0x15b   :  { %v726_v45 = vsel %vm669_vm5, %v1551_v24, %v1558_v28  ;;  %v766_v25 = vsel %vm672_vm6, %v1565_v29, %v1570_v44 }
 0x15c   :  { %v742_v55 = vsel %vm667_vm7, %v702_v3, %v726_v45  ;;  %v806_v57 = vsel %vm668_vm8, %v766_v25, %v790_v5 }
 0x15d   :  { %v822_v42 = vsel %vm666_vm9, %v806_v57, %v742_v55  ;;  %v419_v7 = vpop.f32.mrf.mxu0 }
 0x15e   :  { %838 = vxpose.xlu0.b32.cont [15/16] %v822_v42, 128  ;;  %v484_v8 = vpop.f32.mrf.mxu1  ;;  %vm677_vm10 = vcmp.gt.f32.partialorder %v419_v7, %v1518_v15 }
 0x15f   :  { %vm678_vm11 = vcmp.gt.f32.partialorder %v484_v8, %v1520_v16  ;;  %v703_v54 = vsel %vm677_vm10, %v1525_v17, %v1530_v19  ;;  %v1887_v17 = vld [vmem:[#allocation8_spill] sm:$0xff] }
 0x160   :  { %v791_v4 = vsel %vm678_vm11, %v1535_v18, %v1540_v20  ;;  %vm673_vm0 = vcmp.gt.f32.partialorder %v1887_v17, %v1572_v14 }
 0x161   :  { %v354_v34 = vpop.f32.mrf.mxu3  ;;  %v549_v52 = vpop.f32.mrf.mxu2 }
 0x162   :  { %vm676_vm12 = vcmp.gt.f32.partialorder %v354_v34, %v1546_v23  ;;  %vm679_vm13 = vcmp.gt.f32.partialorder %v549_v52, %v1553_v27 }
 0x163   :  { %v727_v15 = vsel %vm676_vm12, %v1551_v24, %v1558_v28  ;;  %v767_v16 = vsel %vm679_vm13, %v1565_v29, %v1570_v44 }
 0x164   :  { %v743_v19 = vsel %vm674_vm14, %v703_v54, %v727_v15  ;;  %v807_v18 = vsel %vm675_vm15, %v767_v16, %v791_v4 }
 0x165   :  { %v823_v20 = vsel %vm673_vm0, %v807_v18, %v743_v19 }
 0x166   :  { %839 = vxpose.xlu0.b32.end [16/16] %v823_v20, 128 }
 0x192   :  { %v840_v23 = vpop.trf.xlu0 }
 0x19a   :  { %v841_v27 = vpop.trf.xlu0 }
 0x19b   :  { %v856_v31 = vadd.f32 %v841_v27, %v840_v23 }
 0x1a2   :  { %v842_v21 = vpop.trf.xlu0 }
 0x1a3   :  { %v857_v33 = vadd.f32 %v856_v31, %v842_v21 }
 0x1aa   :  { %v843_v47 = vpop.trf.xlu0 }
 0x1ab   :  { %v858_v22 = vadd.f32 %v857_v33, %v843_v47 }
 0x1b2   :  { %v844_v11 = vpop.trf.xlu0 }
 0x1b3   :  { %v859_v12 = vadd.f32 %v858_v22, %v844_v11 }
 0x1ba   :  { %v845_v24 = vpop.trf.xlu0 }
 0x1bb   :  { %v860_v49 = vadd.f32 %v859_v12, %v845_v24 }
 0x1c2   :  { %v846_v28 = vpop.trf.xlu0 }
 0x1c3   :  { %v861_v30 = vadd.f32 %v860_v49, %v846_v28 }
 0x1ca   :  { %v847_v59 = vpop.trf.xlu0 }
 0x1cb   :  { %v862_v39 = vadd.f32 %v861_v30, %v847_v59 }
 0x1d2   :  { %v848_v44 = vpop.trf.xlu0 }
 0x1d3   :  { %v863_v46 = vadd.f32 %v862_v39, %v848_v44 }
 0x1da   :  { %v849_v29 = vpop.trf.xlu0 }
 0x1db   :  { %v864_v41 = vadd.f32 %v863_v46, %v849_v29 }
 0x1e2   :  { %v850_v61 = vpop.trf.xlu0 }
 0x1e3   :  { %v865_v36 = vadd.f32 %v864_v41, %v850_v61 }
 0x1ea   :  { %v851_v14 = vpop.trf.xlu0 }
 0x1eb   :  { %v866_v1 = vadd.f32 %v865_v36, %v851_v14 }
 0x1f2   :  { %v852_v10 = vpop.trf.xlu0 }
 0x1f3   :  { %v867_v40 = vadd.f32 %v866_v1, %v852_v10 }
 0x1fa   :  { %v853_v58 = vpop.trf.xlu0 }
 0x1fb   :  { %v868_v38 = vadd.f32 %v867_v40, %v853_v58 }
 0x202   :  { %v854_v48 = vpop.trf.xlu0 }
 0x203   :  { %v869_v63 = vadd.f32 %v868_v38, %v854_v48 }
 0x20a   :  { %v855_v0 = vpop.trf.xlu0 }
 0x20b   :  { %v870_v56 = vadd.f32 %v869_v63, %v855_v0 }
 0x20d   :  { %v871_v6 = vrot.slane %v870_v56, 4 }
 0x20f   :  { %v872_v62 = vadd.f32 %v871_v6, %v870_v56 }
 0x211   :  { %v873_v51 = vrot.slane %v872_v62, 2 }
 0x213   :  { %v874_v53 = vadd.f32 %v873_v51, %v872_v62 }
 0x215   :  { %v875_v32 = vrot.slane %v874_v53, 1 }
 0x217   :  { %v876_v9 = vadd.f32 %v875_v32, %v874_v53 }
 0x219   :  { %877 = vst [vmem:[#allocation2] sm:$0x1] %v876_v9 }
 0x21a   :  { %888 = dma.vmem_to_hbm [thread:$0]  %s884_s12, 16, %s886_s1, [#allocation3]  }
 0x21b   :  { %1045 = dma.done.wait [#allocation3], 16  }
 0x21c   :  { %1046 = vsyncadd [#allocation3], 4294967280 }
 0x21d   :  { %893 = vsyncpa [#allocation3], 1 }

</bundles_post_ra>
